<compile_context>
chip_gen: v5e
topology: v5e:2x2
jax: 0.10.0
libtpu: 0.0.40
codegen_flags: <defaults>
</compile_context>

<pallas_src>
import numpy as np

import jax
import jax.numpy as jnp
from jax import lax
from jax.experimental import pallas as pl
from jax.experimental.pallas import tpu as pltpu


def _make_clip_loss_kernel(ts, s_orig, s_pad):
    """Kernel factory closing over static tile size / padding info."""
    masked = (s_pad != s_orig)

    def kernel(i_tab_ref, j_tab_ref, inv_temp_ref,
               xr_ref, xc_ref, labr_ref, labc_ref, out_ref):
        t = pl.program_id(1)
        i = i_tab_ref[t]
        j = j_tab_ref[t]

        # Batched gram tile on the MXU: bf16 operands (pre-normalized in the
        # wrapper), f32 accumulation, contracting on D of BOTH operands
        # (no transpose / XLU work).
        logits = lax.dot_general(
            xr_ref[...], xc_ref[...],
            dimension_numbers=(((2,), (2,)), ((0,), (0,))),
            preferred_element_type=jnp.float32)          # (bblk, ts, ts) f32
        # Apply 1/clamp(temperature) on the f32 logits (sits in VALU slack)
        # instead of folding it into the bf16 operands -> better accuracy.
        logits = logits * inv_temp_ref[0]

        # binary_cross_entropy_with_logits, reduction='none' (stable form):
        #   l = max(x, 0) - x * [label] + log1p(exp(-|x|))
        # label matrix is a pure broadcast equality of the two label views.
        eq = labr_ref[...] == labc_ref[...]              # (bblk, ts, ts)
        loss = (jnp.maximum(logits, 0.0)
                - jnp.where(eq, logits, 0.0)
                + jnp.log1p(jnp.exp(-jnp.abs(logits))))
        # TODO(synk): optionally evaluate the softplus term at bf16 on the EUP
        # (v6e/v7x) once a verified chip-version query is available.

        if masked:
            # Padding fallback: zero the contribution of padded rows/cols.
            row_ids = i * ts + lax.broadcasted_iota(jnp.int32, (1, ts, 1), 1)
            col_ids = j * ts + lax.broadcasted_iota(jnp.int32, (1, 1, ts), 2)
            loss = jnp.where((row_ids < s_orig) & (col_ids < s_orig), loss, 0.0)

        block_sum = jnp.sum(loss)
        # Upper-triangular visitation: off-diagonal tiles also stand in for
        # their (exactly symmetric) mirror tile.
        block_sum = jnp.where(i == j, block_sum, 2.0 * block_sum)

        # Each grid step owns a distinct lane-dense (8,128) output tile
        # (unmasked vector stores, fully parallel grid).  Wrapper reads [0,0].
        out_ref[0] = jnp.full((8, 128), block_sum, dtype=jnp.float32)

    return kernel


def _vmem_params():
    """Generation-aware per-step VMEM budget + scoped limit."""
    try:
        cap = int(pltpu.get_tpu_info().vmem_capacity_bytes)
    except Exception:
        cap = 64 * 1024 * 1024            # conservative (v7x per-core VMEM)
    budget = min(44 * 1024 * 1024, cap // 3)   # ~21 MiB on v7x, ~42 MiB on v5e/v6e
    vmem_limit = min(cap * 3 // 4, budget * 3)
    return budget, vmem_limit


def _choose_tiles(B, S, D, budget):
    """Pick (batch_block, seq_tile, padded_S) keeping per-step VMEM <= budget."""
    def step_bytes(bblk, ts):
        tok = bblk * ts * D * 2                 # bf16 pre-normalized tokens
        inputs = 2 * 2 * tok                    # row + col operand, double-buffered
        labels = 2 * 2 * bblk * (2 * ts) * 4    # two int32 label views
        tiles = 5 * bblk * ts * ts * 4          # logits / eq / loss temporaries
        return inputs + labels + tiles

    if S <= 1024 and step_bytes(1, S) <= budget:
        ts, s_pad = S, S
    else:
        ts = None
        for cand in (1024, 768, 512, 384, 256, 128):
            if S % cand == 0 and step_bytes(1, cand) <= budget:
                ts, s_pad = cand, S
                break
        if ts is None:
            # Padding fallback: round S up to a multiple of a budget-fitting tile.
            ts = 128
            for cand in (512, 256):
                if step_bytes(1, cand) <= budget:
                    ts = cand
                    break
            s_pad = ((S + ts - 1) // ts) * ts

    bblk = 1
    for cand in range(B, 0, -1):
        if B % cand == 0 and step_bytes(cand, ts) <= budget:
            bblk = cand
            break
    return bblk, ts, s_pad


def clip_loss(encoded_tokens, contrastive_label, temperature,
              temperature_max=100.0, reduction='mean'):
    """Pallas implementation of ClipLoss.forward (reduction in {'mean','sum'})."""
    # TODO(synk): reduction='none' (full (B,S,S) loss matrix output) is not
    # wired up in-kernel; only the scalar reductions are implemented.
    B, S, D = encoded_tokens.shape
    if reduction == 'mean':
        scale = 1.0 / float(B * S * S)
    elif reduction == 'sum':
        scale = 1.0
    else:
        raise ValueError("Invalid reduction method. Use 'mean' or 'sum'.")

    budget, vmem_limit = _vmem_params()
    bblk, ts, s_pad = _choose_tiles(B, S, D, budget)
    nb, ni = B // bblk, s_pad // ts

    # Upper-triangular (i, j) tile schedule (j >= i), fed to the index_maps
    # via scalar prefetch.
    ii, jj = np.triu_indices(ni)
    n_tri = int(ii.shape[0])
    i_tab = jnp.asarray(ii, dtype=jnp.int32)
    j_tab = jnp.asarray(jj, dtype=jnp.int32)

    # Clamped temperature -> reciprocal, as a (1,) f32 SMEM scalar.
    temp_c = jnp.minimum(jnp.asarray(temperature, dtype=jnp.float32),
                         jnp.asarray(temperature_max, dtype=jnp.float32))
    inv_temp = (1.0 / temp_c).reshape(1)

    # Pre-normalize tokens ONCE in the wrapper (matches torch: v / (||v|| + 1e-10))
    # into a single bf16 array that serves both matmul operands.
    x = encoded_tokens.astype(jnp.float32)
    norm = jnp.sqrt(jnp.sum(x * x, axis=-1, keepdims=True))
    xn = (x / (norm + 1e-10)).astype(jnp.bfloat16)

    lab = contrastive_label.astype(jnp.int32)
    if s_pad != S:
        xn = jnp.pad(xn, ((0, 0), (0, s_pad - S), (0, 0)))
        lab = jnp.pad(lab, ((0, 0), (0, s_pad - S)), constant_values=-1)

    # Two pre-laid-out label views: row-major (B,S,1) and col-major (B,1,S),
    # so the equality matrix in-kernel is a pure broadcast.
    lab_rows = lab.reshape(B, s_pad, 1)
    lab_cols = lab.reshape(B, 1, s_pad)

    kernel = _make_clip_loss_kernel(ts, S, s_pad)

    partials = pl.pallas_call(
        kernel,
        out_shape=jax.ShapeDtypeStruct((nb * n_tri, 8, 128), jnp.float32),
        grid_spec=pltpu.PrefetchScalarGridSpec(
            num_scalar_prefetch=2,
            grid=(nb, n_tri),
            in_specs=[
                pl.BlockSpec(memory_space=pltpu.MemorySpace.SMEM),           # 1/temp
                pl.BlockSpec((bblk, ts, D), lambda b, t, it, jt: (b, it[t], 0)),
                pl.BlockSpec((bblk, ts, D), lambda b, t, it, jt: (b, jt[t], 0)),
                pl.BlockSpec((bblk, ts, 1), lambda b, t, it, jt: (b, it[t], 0)),
                pl.BlockSpec((bblk, 1, ts), lambda b, t, it, jt: (b, 0, jt[t])),
            ],
            out_specs=pl.BlockSpec(
                (1, 8, 128),
                lambda b, t, it, jt: (b * n_tri + t, 0, 0)),
        ),
        compiler_params=pltpu.CompilerParams(
            dimension_semantics=("parallel", "parallel"),
            vmem_limit_bytes=int(vmem_limit)),
    )(i_tab, j_tab, inv_temp, xn, xn, lab_rows, lab_cols)

    return jnp.sum(partials[:, 0, 0]) * jnp.float32(scale)


def _clip_loss_ref(encoded_tokens, contrastive_label, temperature,
                   temperature_max=100.0):
    """Pure-JAX reference mirroring the PyTorch module (reduction='mean')."""
    x = encoded_tokens.astype(jnp.float32)
    norm = jnp.linalg.norm(x, axis=-1, keepdims=True)
    xn = x / (norm + 1e-10)
    temp = jnp.minimum(jnp.float32(temperature), jnp.float32(temperature_max))
    logits = jnp.einsum('bsd,btd->bst', xn, xn) / temp
    lbl = contrastive_label
    labels = (lbl[:, :, None] == lbl[:, None, :]).astype(jnp.float32)
    loss = (jnp.maximum(logits, 0.0) - logits * labels
            + jnp.log1p(jnp.exp(-jnp.abs(logits))))
    return jnp.mean(loss)


if __name__ == "__main__":
    key = jax.random.PRNGKey(0)
    k1, k2 = jax.random.split(key)

    B, S, D = 2, 8, 32
    encoded_tokens = jax.random.normal(k1, (B, S, D), dtype=jnp.float32)
    contrastive_label = jax.random.randint(k2, (B, S), 0, 3, dtype=jnp.int32)

    # deterministic parameter init, as in the module's __init__
    temperature_initial = 0.07
    temperature_max = 100.0

    loss = clip_loss(encoded_tokens, contrastive_label,
                     temperature_initial, temperature_max, reduction='mean')
    loss = jax.block_until_ready(loss)

    ref = _clip_loss_ref(encoded_tokens, contrastive_label,
                         temperature_initial, temperature_max)
    # Tolerance loosened vs. pure f32: the kernel feeds the MXU bf16 operands
    # (with f32 accumulation).
    assert jnp.allclose(loss, ref, rtol=2e-2, atol=2e-2), (loss, ref)

    print("KERNEL_OK")
</pallas_src>

<mosaic_0001>
module attributes {stable_mosaic.version = 11 : i64} {
  func.func @kernel(%arg0: i32, %arg1: i32, %arg2: memref<1xi32, #tpu.memory_space<smem>>, %arg3: memref<1xi32, #tpu.memory_space<smem>>, %arg4: memref<1xf32, #tpu.memory_space<smem>>, %arg5: memref<2x8x32xbf16, #tpu.memory_space<vmem>>, %arg6: memref<2x8x32xbf16, #tpu.memory_space<vmem>>, %arg7: memref<2x8x1xi32, #tpu.memory_space<vmem>>, %arg8: memref<2x1x8xi32, #tpu.memory_space<vmem>>, %arg9: memref<1x8x128xf32, #tpu.memory_space<vmem>>) attributes {dimension_semantics = [#tpu.dimension_semantics<parallel>, #tpu.dimension_semantics<parallel>], iteration_bounds = array<i64: 1, 1>, scalar_prefetch = 2 : i64, scratch_operands = 0 : i64, tpu.core_type = #tpu.core_type<tc>, window_params = [{transform_indices = @transform_0, window_bounds = array<i64: 1>}, {transform_indices = @transform_1, window_bounds = array<i64: 2, 8, 32>}, {transform_indices = @transform_2, window_bounds = array<i64: 2, 8, 32>}, {transform_indices = @transform_3, window_bounds = array<i64: 2, 8, 1>}, {transform_indices = @transform_4, window_bounds = array<i64: 2, 1, 8>}, {transform_indices = @transform_5, window_bounds = array<i64: 1, 8, 128>}]} {
    %0 = arith.index_cast %arg1 : i32 to index
    %1 = memref.load %arg2[%0] : memref<1xi32, #tpu.memory_space<smem>>
    %2 = arith.index_cast %arg1 : i32 to index
    %3 = memref.load %arg3[%2] : memref<1xi32, #tpu.memory_space<smem>>
    %c0 = arith.constant 0 : index
    %c0_0 = arith.constant 0 : index
    %c0_1 = arith.constant 0 : index
    %4 = vector.load %arg5[%c0, %c0_0, %c0_1] : memref<2x8x32xbf16, #tpu.memory_space<vmem>>, vector<2x8x32xbf16>
    %c0_2 = arith.constant 0 : index
    %c0_3 = arith.constant 0 : index
    %c0_4 = arith.constant 0 : index
    %5 = vector.load %arg6[%c0_2, %c0_3, %c0_4] : memref<2x8x32xbf16, #tpu.memory_space<vmem>>, vector<2x8x32xbf16>
    %cst = arith.constant dense<0.000000e+00> : vector<2x8x8xf32>
    %6 = tpu.matmul %4, %5, %cst {dimension_numbers = #tpu.dot_dimension_numbers<[2], [2], [1], [1], [0, 0, 0, 1, 1, 1], [0], [0]>} : vector<2x8x32xbf16>, vector<2x8x32xbf16>, vector<2x8x8xf32> -> vector<2x8x8xf32>
    %c0_5 = arith.constant 0 : index
    %7 = memref.load %arg4[%c0_5] : memref<1xf32, #tpu.memory_space<smem>>
    %8 = vector.broadcast %7 : f32 to vector<2x8x8xf32>
    %9 = arith.mulf %6, %8 : vector<2x8x8xf32>
    %c0_6 = arith.constant 0 : index
    %c0_7 = arith.constant 0 : index
    %c0_8 = arith.constant 0 : index
    %10 = vector.load %arg7[%c0_6, %c0_7, %c0_8] : memref<2x8x1xi32, #tpu.memory_space<vmem>>, vector<2x8x1xi32>
    %c0_9 = arith.constant 0 : index
    %c0_10 = arith.constant 0 : index
    %c0_11 = arith.constant 0 : index
    %11 = vector.load %arg8[%c0_9, %c0_10, %c0_11] : memref<2x1x8xi32, #tpu.memory_space<vmem>>, vector<2x1x8xi32>
    %12 = vector.broadcast %10 : vector<2x8x1xi32> to vector<2x8x8xi32>
    %13 = vector.broadcast %11 : vector<2x1x8xi32> to vector<2x8x8xi32>
    %14 = arith.cmpi eq, %12, %13 : vector<2x8x8xi32>
    %cst_12 = arith.constant 0.000000e+00 : f32
    %15 = vector.broadcast %cst_12 : f32 to vector<2x8x8xf32>
    %16 = arith.maximumf %9, %15 : vector<2x8x8xf32>
    %cst_13 = arith.constant 0.000000e+00 : f32
    %17 = vector.broadcast %cst_13 : f32 to vector<2x8x8xf32>
    %18 = arith.select %14, %9, %17 : vector<2x8x8xi1>, vector<2x8x8xf32>
    %19 = arith.subf %16, %18 : vector<2x8x8xf32>
    %20 = math.absf %9 : vector<2x8x8xf32>
    %cst_14 = arith.constant 0.000000e+00 : f32
    %21 = vector.broadcast %cst_14 : f32 to vector<2x8x8xf32>
    %22 = arith.subf %21, %20 : vector<2x8x8xf32>
    %23 = math.exp %22 : vector<2x8x8xf32>
    %24 = math.log1p %23 : vector<2x8x8xf32>
    %25 = arith.addf %19, %24 : vector<2x8x8xf32>
    %26 = vector.shape_cast %25 : vector<2x8x8xf32> to vector<1x2x8x8xf32>
    %cst_15 = arith.constant dense<0.000000e+00> : vector<1xf32>
    %27 = vector.multi_reduction <add>, %26, %cst_15 [1, 2, 3] : vector<1x2x8x8xf32> to vector<1xf32>
    %28 = vector.shape_cast %27 : vector<1xf32> to vector<1x1x1x1xf32>
    %29 = vector.extract %28[0, 0, 0, 0] : f32 from vector<1x1x1x1xf32>
    %30 = arith.cmpi eq, %1, %3 : i32
    %cst_16 = arith.constant 2.000000e+00 : f32
    %31 = arith.mulf %cst_16, %29 : f32
    %32 = arith.select %30, %29, %31 : f32
    %33 = vector.broadcast %32 : f32 to vector<8x128xf32>
    %c0_17 = arith.constant 0 : index
    %c0_18 = arith.constant 0 : index
    %c0_19 = arith.constant 0 : index
    %34 = vector.load %arg9[%c0_17, %c0_18, %c0_19] : memref<1x8x128xf32, #tpu.memory_space<vmem>>, vector<1x8x128xf32>
    %35 = vector.shape_cast %34 : vector<1x8x128xf32> to vector<8x128xf32>
    %36 = vector.shape_cast %33 : vector<8x128xf32> to vector<1x8x128xf32>
    tpu.vector_store %arg9[%c0_17, %c0_18, %c0_19], %36 {strides = array<i32>} : memref<1x8x128xf32, #tpu.memory_space<vmem>>, vector<1x8x128xf32>,
    return
  }
  func.func @transform_0(%arg0: i32, %arg1: i32, %arg2: memref<1xi32, #tpu.memory_space<smem>>, %arg3: memref<1xi32, #tpu.memory_space<smem>>) -> i32 {
    %c0_i32 = arith.constant 0 : i32
    %c0_i32_0 = arith.constant 0 : i32
    return %c0_i32 : i32
  }
  func.func @transform_1(%arg0: i32, %arg1: i32, %arg2: memref<1xi32, #tpu.memory_space<smem>>, %arg3: memref<1xi32, #tpu.memory_space<smem>>) -> (i32, i32, i32) {
    %0 = arith.index_cast %arg1 : i32 to index
    %1 = memref.load %arg2[%0] : memref<1xi32, #tpu.memory_space<smem>>
    %c0_i32 = arith.constant 0 : i32
    %c0_i32_0 = arith.constant 0 : i32
    return %arg0, %1, %c0_i32 : i32, i32, i32
  }
  func.func @transform_2(%arg0: i32, %arg1: i32, %arg2: memref<1xi32, #tpu.memory_space<smem>>, %arg3: memref<1xi32, #tpu.memory_space<smem>>) -> (i32, i32, i32) {
    %0 = arith.index_cast %arg1 : i32 to index
    %1 = memref.load %arg3[%0] : memref<1xi32, #tpu.memory_space<smem>>
    %c0_i32 = arith.constant 0 : i32
    %c0_i32_0 = arith.constant 0 : i32
    return %arg0, %1, %c0_i32 : i32, i32, i32
  }
  func.func @transform_3(%arg0: i32, %arg1: i32, %arg2: memref<1xi32, #tpu.memory_space<smem>>, %arg3: memref<1xi32, #tpu.memory_space<smem>>) -> (i32, i32, i32) {
    %0 = arith.index_cast %arg1 : i32 to index
    %1 = memref.load %arg2[%0] : memref<1xi32, #tpu.memory_space<smem>>
    %c0_i32 = arith.constant 0 : i32
    %c0_i32_0 = arith.constant 0 : i32
    return %arg0, %1, %c0_i32 : i32, i32, i32
  }
  func.func @transform_4(%arg0: i32, %arg1: i32, %arg2: memref<1xi32, #tpu.memory_space<smem>>, %arg3: memref<1xi32, #tpu.memory_space<smem>>) -> (i32, i32, i32) {
    %0 = arith.index_cast %arg1 : i32 to index
    %1 = memref.load %arg3[%0] : memref<1xi32, #tpu.memory_space<smem>>
    %c0_i32 = arith.constant 0 : i32
    %c0_i32_0 = arith.constant 0 : i32
    return %arg0, %c0_i32, %1 : i32, i32, i32
  }
  func.func @transform_5(%arg0: i32, %arg1: i32, %arg2: memref<1xi32, #tpu.memory_space<smem>>, %arg3: memref<1xi32, #tpu.memory_space<smem>>) -> (i32, i32, i32) {
    %c1_i32 = arith.constant 1 : i32
    %0 = arith.muli %arg0, %c1_i32 : i32
    %1 = arith.addi %0, %arg1 : i32
    %c0_i32 = arith.constant 0 : i32
    %c0_i32_0 = arith.constant 0 : i32
    %c0_i32_1 = arith.constant 0 : i32
    return %1, %c0_i32, %c0_i32_0 : i32, i32, i32
  }
}

</mosaic_0001>

<bundles_post_ra>
// kernel: tpu_custom_call.1
= control target key start
LH: loop header
LB: loop body
LE: loop exit
PB: predicated region body
PF: predicated region fallthrough
CT: control target
= control target key end

     0   :  { %s380_s0 = inlined_call_operand.<no memory space> [shape: s32[1], index: 0, kind: input, shape index: {}]   ;;  %s381_s1 = inlined_call_operand.<no memory space> [shape: s32[1], index: 1, kind: input, shape index: {}]   ;;  %s382_s2 = inlined_call_operand.<no memory space> [shape: f32[1], index: 2, kind: input, shape index: {}]   ;;  %s383_s3 = inlined_call_operand.vmem [shape: bf16[2,8,32], index: 3, kind: input, shape index: {}]   ;;  %s384_s4 = inlined_call_operand.vmem [shape: bf16[2,8,32], index: 4, kind: input, shape index: {}]   ;;  %s385_s5 = inlined_call_operand.vmem [shape: s32[2,8,1], index: 5, kind: input, shape index: {}]   ;;  %s386_s6 = inlined_call_operand.vmem [shape: s32[2,1,8], index: 6, kind: input, shape index: {}]   ;;  %s387_s7 = inlined_call_operand.hbm [shape: f32[1,8,128], index: 7, kind: output, shape index: {}]  }
   0x1   :  { %p75_p0 = scmp.lt.s32.totalorder %s381_s1, 0  ;;  %p69_p1 = scmp.lt.s32.totalorder %s380_s0, 0 }
   0x2   :  { %15 = vsyncpa [#allocation7], 0  ;;  %v294_v0 = vmov 0   ;;  %vm99_vm0 = vcmask 261120   ;;  %v139_v9 = vstv %s382_s2  ;;  %vm190_vm5 = vcmask 64512   ;;  %p203_p2 = scmp.eq.s32.totalorder %s380_s0, %s381_s1  ;;  %s295_s28 = smov [#allocation6]  }
   0x3   :  { %257 = vset.pattern.permute.xlu0 %v294_v0  ;;  %s76_s30 = scalar_select %p75_p0, %s381_s1, 0 }
   0x4   :  { %s70_s10 = scalar_select %p69_p1, %s380_s0, 0 }
   0x5   :  { %s249_s11 = sshll.u32 %s76_s30, 2  ;;  %s351_s14 = scalar_lea.vmem %s386_s6, %s76_s30 }
   0x6   :  { %s78_s17 = scalar_lea.vmem %s384_s4, %s249_s11  ;;  %s248_s18 = sshll.u32 %s70_s10, 2  ;;  %v258_v25 = vld [vmem:[%s351_s14] ss:$0 sm:$0xff]  ;;  %v259_v27 = vld [vmem:[%s351_s14 + $0x1] ss:$0 sm:$0xff] }
   0x7   :  { %v97_v1 = vld [vmem:[%s78_s17] sm:$0xf]  ;;  %v98_v2 = vld [vmem:[%s78_s17 + $0x4] sm:$0xf]  ;;  %s250_s19 = sshll.u32 %s70_s10, 3  ;;  %s72_s24 = scalar_lea.vmem %s383_s3, %s248_s18 }
   0x8   :  { %v104_v3 = vsel %vm99_vm0, %v97_v1, 0  ;;  %v123_v4 = vsel %vm99_vm0, %v98_v2, 0  ;;  %s84_s22 = scalar_lea.vmem %s385_s5, %s250_s19  ;;  %v95_v6 = vld [vmem:[%s72_s24] sm:$0xf]  ;;  %v96_v7 = vld [vmem:[%s72_s24 + $0x4] sm:$0xf] }
   0x9   :  { %113 = vmatpush.bf16.xpose.msra.mxu0 %v104_v3  ;;  %132 = vmatpush.bf16.xpose.msra.mxu1 %v123_v4  ;;  %v142_v5 = vld [vmem:[%s84_s22] sm:$0xff]  ;;  %v143_v8 = vld [vmem:[%s84_s22 + $0x8] sm:$0xff]  ;;  %s216_s29 = sshll.u32 %s295_s28, 4  ;;  %s218_s10 = sshll.u32 %s387_s7, 4  ;;  %s217_s29 = int_to_ptr.vmem [resolvable:$true] %s216_s29  ;;  %s219_s10 = int_to_ptr.hbm [resolvable:$true] %s218_s10 }
   0xa   :  { %147 = vperm.xlu0 %257, %v142_v5  }
  0x10   :  { %251 = vmatmul.msk.bf16.vlgmr.msra.gmra.mxu0 %vm99_vm0, %v95_v6  ;;  %252 = vmatmul.msk.bf16.vlgmr.msra.gmra.mxu1 %vm99_vm0, %v96_v7 }
  0x12   :  { %150 = vperm.xlu0 %257, %v143_v8  }
  0x7c   :  { %v148_v18 = vpop.permute.xlu0 %147 }
  0x7d   :  { %vm154_vm1 = vcmp.eq.s32.totalorder %v148_v18, %v258_v25 }
  0x84   :  { %v151_v30 = vpop.permute.xlu0 %150 }
  0x85   :  { %vm155_vm2 = vcmp.eq.s32.totalorder %v151_v30, %v259_v27 }
  0x8d   :  { %v115_v10 = vpop.f32.mrf.mxu0  ;;  %v134_v11 = vpop.f32.mrf.mxu1 }
  0x8e   :  { %v140_v12 = vmul.f32 %v139_v9, %v115_v10  ;;  %v141_v13 = vmul.f32 %v139_v9, %v134_v11 }
  0x90   :  { %v162_v14 = vand.u32 2147483647, %v140_v12  ;;  %v163_v15 = vand.u32 2147483647, %v141_v13  ;;  %v156_v33 = vmax.f32 %v140_v12, 0.0  ;;  %v158_v36 = vsel %vm154_vm1, %v140_v12, 0.0 }
  0x91   :  { %v157_v37 = vmax.f32 %v141_v13, 0.0  ;;  %v159_v40 = vsel %vm155_vm2, %v141_v13, 0.0 }
  0x92   :  { %v164_v16 = vsub.f32 0.0, %v162_v14  ;;  %v165_v17 = vsub.f32 0.0, %v163_v15  ;;  %v160_v44 = vsub.f32 %v156_v33, %v158_v36 }
  0x93   :  { %v161_v47 = vsub.f32 %v157_v37, %v159_v40 }
  0x94   :  { %v166_v19 = vmul.f32 1.442695, %v164_v16  ;;  %v168_v20 = vmul.f32 1.442695, %v165_v17 }
  0x95   :  { %v117_v21 = vpop.f32.mrf.mxu0  ;;  %v136_v22 = vpop.f32.mrf.mxu1 }
  0x96   :  { %260 = vpow2.f32 %v166_v19 }
  0x97   :  { %262 = vpow2.f32 %v168_v20 }
  0x9c   :  { %v261_v23 = vpop.eup %260 }
  0x9d   :  { %v263_v24 = vpop.eup %262  ;;  %v170_v26 = vadd.f32 1.0, %v261_v23  ;;  %v173_v28 = vmul.f32 -0.5, %v261_v23  ;;  %v176_v34 = vand.u32 2147483647, %v261_v23 }
  0x9e   :  { %v179_v29 = vadd.f32 1.0, %v263_v24  ;;  %v182_v31 = vmul.f32 -0.5, %v263_v24  ;;  %v185_v38 = vand.u32 2147483647, %v263_v24 }
  0x9f   :  { %264 = vlog2.f32 %v170_v26  ;;  %v174_v32 = vadd.f32 1.0, %v173_v28  ;;  %vm177_vm3 = vcmp.lt.f32.partialorder %v176_v34, 0.0004427343 }
  0xa0   :  { %266 = vlog2.f32 %v179_v29  ;;  %v183_v35 = vadd.f32 1.0, %v182_v31  ;;  %vm186_vm4 = vcmp.lt.f32.partialorder %v185_v38, 0.0004427343 }
  0xa1   :  { %v175_v43 = vmul.f32 %v261_v23, %v174_v32 }
  0xa2   :  { %v184_v46 = vmul.f32 %v263_v24, %v183_v35 }
  0xa5   :  { %v265_v39 = vpop.eup %264 }
  0xa6   :  { %v267_v41 = vpop.eup %266  ;;  %v172_v42 = vmul.f32 0.6931472, %v265_v39 }
  0xa7   :  { %v181_v45 = vmul.f32 0.6931472, %v267_v41 }
  0xa8   :  { %v178_v48 = vsel %vm177_vm3, %v175_v43, %v172_v42 }
  0xa9   :  { %v187_v49 = vsel %vm186_vm4, %v184_v46, %v181_v45  ;;  %v188_v50 = vadd.f32 %v178_v48, %v160_v44 }
  0xaa   :  { %v189_v51 = vadd.f32 %v187_v49, %v161_v47 }
  0xab   :  { %v191_v52 = vsel %vm190_vm5, %v188_v50, 0.0 }
  0xac   :  { %v192_v53 = vsel %vm190_vm5, %v189_v51, 0.0 }
  0xad   :  { %v193_v54 = vadd.f32 %v192_v53, %v191_v52 }
  0xaf   :  { %194 = vadd.xlane.f32.xlu1 %v193_v54 }
 0x122   :  { %v195_v55 = vpop.xlane.xlu1 %194 }
 0x123   :  { %v196_v56 = vrot.slane %v195_v55, 4 }
 0x125   :  { %v197_v57 = vadd.f32 %v196_v56, %v195_v55 }
 0x127   :  { %v198_v58 = vrot.slane %v197_v57, 2 }
 0x129   :  { %v199_v59 = vadd.f32 %v198_v58, %v197_v57 }
 0x12b   :  { %v200_v60 = vrot.slane %v199_v59, 1 }
 0x12d   :  { %v201_v61 = vadd.f32 %v200_v60, %v199_v59 }
 0x12f   :  { %253 = vpush %v201_v61 }
 0x160   :  { %s254_s27 = spop %253 }
 0x161   :  { %s204_s30 = smul.f32 2.0, %s254_s27 }
 0x163   :  { %s389_s27 = smov (!%p203_p2, %s254_s27), %s204_s30 }
 0x164   :  { %v206_v62 = vstv %s389_s27 }
 0x165   :  { %207 = vst [vmem:[#allocation6] sm:$0xff] %v206_v62 }
 0x166   :  { %221 = dma.vmem_to_hbm [thread:$0]  %s217_s29, 128, %s219_s10, [#allocation7]  }
 0x167   :  { %292 = dma.done.wait [#allocation7], 128  }
 0x168   :  { %293 = vsyncadd [#allocation7], 4294967168 }
 0x169   :  { %226 = vsyncpa [#allocation7], 1 }

</bundles_post_ra>
